<compile_context>
chip_gen: v7x
topology: tpu7x:2x2x1
jax: 0.10.0
libtpu: 0.0.40
codegen_flags: <defaults>
</compile_context>

<pallas_src>
import math

import jax
import jax.numpy as jnp
from jax.experimental import pallas as pl
from jax.experimental.pallas import tpu as pltpu

STATE_DIM = 17      # small synthetic state dimension
ACTION_DIM = 6      # small synthetic action dimension
HIDDEN = 512        # matches nn.Linear(state_dim, 512) etc.
MAX_ACTION = 2.0
BATCH = 8
LANE = 128


def _round_up(x, m):
    return ((x + m - 1) // m) * m


def _choose_batch_tile(batch):
    """Pick (tb rows per grid step, padded batch rows).

    * batch <= 512: one grid step (per-step fixed overhead dominates the tiny
      per-step compute, so never split small batches).
    * batch  > 512: tb from {1024, 512, 256} minimizing an estimated cost of
      steps * fixed_overhead + padded_rows * per_row_compute, always with
      >= 2 steps so the 'parallel' grid can shard across both v7x TensorCores
      and the tail padding stays bounded.
    """
    if batch <= 512:
        tb = _round_up(batch, 16)          # bf16 sublane packing: (16,128) tiles
        return tb, tb
    best = None
    for tb in (1024, 512, 256):
        pad = _round_up(batch, tb)
        steps = pad // tb
        if steps < 2:
            continue
        # ~0.35us fixed per grid step; ~0.2us per 256 rows of 3-layer compute.
        cost = steps * 0.35 + pad * (0.2 / 256.0)
        if best is None or cost < best[1]:
            best = (tb, cost, pad)
    tb, _, pad = best
    return tb, pad


def actor_kernel(ma_ref, x_ref, w12_ref, w3_ref, b_ref, o_ref):
    """Fused relu(xW1+b1) -> relu(.W2+b2) -> max_action*tanh(.W3+b3)."""
    hidden = w12_ref.shape[1]            # 512
    pad_in = w12_ref.shape[0] - hidden   # padded state dim (128)

    max_action = ma_ref[0, 0]
    x = x_ref[...]                       # already bf16 (wrapper-side cast)

    # Layer 1: Linear + ReLU (bf16 MXU operands, f32 accumulation, f32 bias)
    h = jnp.dot(x, w12_ref[:pad_in, :], preferred_element_type=jnp.float32)
    h = jnp.maximum(h + b_ref[:, :hidden], 0.0)
    # Layer 2: Linear + ReLU
    h = jnp.dot(h.astype(jnp.bfloat16), w12_ref[pad_in:, :],
                preferred_element_type=jnp.float32)
    h = jnp.maximum(h + b_ref[:, hidden:2 * hidden], 0.0)
    # Layer 3: Linear + tanh, scaled by max_action (EUP tanh, f32)
    h = jnp.dot(h.astype(jnp.bfloat16), w3_ref[...],
                preferred_element_type=jnp.float32)
    h = h + b_ref[:, 2 * hidden:]
    o_ref[...] = (max_action * jnp.tanh(h)).astype(o_ref.dtype)


def pack_actor_params(w1, b1, w2, b2, w3, b3):
    """Pad + pack PyTorch-layout ((in,out)/(1,out)) params into kernel slabs."""
    state_dim, hidden = w1.shape
    action_dim = w3.shape[1]
    pad_in = _round_up(max(state_dim, 8), LANE)
    pad_out = _round_up(max(action_dim, 8), LANE)

    w1p = jnp.zeros((pad_in, hidden), jnp.float32).at[:state_dim, :].set(w1)
    w12 = jnp.concatenate([w1p, w2], axis=0).astype(jnp.bfloat16)   # (pad_in+512, 512)
    w3p = (jnp.zeros((hidden, pad_out), jnp.float32)
           .at[:, :action_dim].set(w3)).astype(jnp.bfloat16)        # (512, pad_out)
    bp = (jnp.zeros((1, 2 * hidden + pad_out), jnp.float32)
          .at[:, :hidden].set(b1.reshape(1, -1))
          .at[:, hidden:2 * hidden].set(b2.reshape(1, -1))
          .at[:, 2 * hidden:2 * hidden + action_dim].set(b3.reshape(1, -1)))
    return w12, w3p, bp


def actor_forward(x, packed_params, max_action, action_dim):
    w12, w3p, bp = packed_params
    batch, state_dim = x.shape
    hidden = w12.shape[1]
    pad_in = w12.shape[0] - hidden
    pad_out = w3p.shape[1]
    n_w12_rows = pad_in + hidden

    tb, pad_batch = _choose_batch_tile(batch)

    # x lives in bf16 end-to-end (halves x DMA bytes; MXU operands are bf16
    # anyway).  Output stays f32 and lane-dense (pad_out = 128).
    xp = (jnp.zeros((pad_batch, pad_in), jnp.bfloat16)
          .at[:batch, :state_dim].set(x.astype(jnp.bfloat16)))
    ma = jnp.full((1, 1), max_action, jnp.float32)

    flops = 2 * pad_batch * (pad_in * hidden + hidden * hidden + hidden * pad_out)
    bytes_accessed = (w12.size * 2 + w3p.size * 2 + bp.size * 4
                      + xp.size * 2 + pad_batch * pad_out * 4)

    out = pl.pallas_call(
        actor_kernel,
        out_shape=jax.ShapeDtypeStruct((pad_batch, pad_out), jnp.float32),
        grid=(pad_batch // tb,),
        in_specs=[
            pl.BlockSpec(memory_space=pltpu.MemorySpace.SMEM),          # max_action
            pl.BlockSpec((tb, pad_in), lambda i: (i, 0)),               # x tile (bf16)
            pl.BlockSpec((n_w12_rows, hidden), lambda i: (0, 0)),       # w1|w2 slab
            pl.BlockSpec((hidden, pad_out), lambda i: (0, 0)),          # w3 (padded)
            pl.BlockSpec((1, 2 * hidden + pad_out), lambda i: (0, 0)),  # bias slab
        ],
        out_specs=pl.BlockSpec((tb, pad_out), lambda i: (i, 0)),
        compiler_params=pltpu.CompilerParams(
            dimension_semantics=("parallel",)),
        cost_estimate=pl.CostEstimate(
            flops=flops,
            transcendentals=pad_batch * pad_out,
            bytes_accessed=bytes_accessed),
    )(ma, xp, w12, w3p, bp)
    return out[:batch, :action_dim]


def init_linear(key, fan_in, fan_out):
    # PyTorch nn.Linear default init: U(-1/sqrt(fan_in), 1/sqrt(fan_in)).
    kw, kb = jax.random.split(key)
    bound = 1.0 / math.sqrt(fan_in)
    w = jax.random.uniform(kw, (fan_in, fan_out), jnp.float32, -bound, bound)
    b = jax.random.uniform(kb, (1, fan_out), jnp.float32, -bound, bound)
    return w, b


def reference_forward_bf16(x, params, max_action):
    # Mirrors the kernel's bf16 weight/operand storage with f32 accumulation.
    w1, b1, w2, b2, w3, b3 = params
    bf = lambda a: a.astype(jnp.bfloat16)
    h = jnp.maximum(
        jnp.dot(bf(x), bf(w1), preferred_element_type=jnp.float32) + b1, 0.0)
    h = jnp.maximum(
        jnp.dot(bf(h), bf(w2), preferred_element_type=jnp.float32) + b2, 0.0)
    h = jnp.dot(bf(h), bf(w3), preferred_element_type=jnp.float32) + b3
    return max_action * jnp.tanh(h)


def reference_forward_f32(x, params, max_action):
    # Exact PyTorch-semantics f32 reference (for a loose sanity check).
    w1, b1, w2, b2, w3, b3 = params
    h = jnp.maximum(x @ w1 + b1, 0.0)
    h = jnp.maximum(h @ w2 + b2, 0.0)
    return max_action * jnp.tanh(h @ w3 + b3)


if __name__ == "__main__":
    key = jax.random.PRNGKey(0)
    k_x, k1, k2, k3 = jax.random.split(key, 4)

    x = jax.random.normal(k_x, (BATCH, STATE_DIM), jnp.float32)
    w1, b1 = init_linear(k1, STATE_DIM, HIDDEN)
    w2, b2 = init_linear(k2, HIDDEN, HIDDEN)
    w3, b3 = init_linear(k3, HIDDEN, ACTION_DIM)
    params = (w1, b1, w2, b2, w3, b3)
    packed = pack_actor_params(*params)

    # Small batch: single-step grid path.
    out = jax.block_until_ready(actor_forward(x, packed, MAX_ACTION, ACTION_DIM))
    assert out.shape == (BATCH, ACTION_DIM)
    ref_bf16 = reference_forward_bf16(x, params, MAX_ACTION)
    ref_f32 = reference_forward_f32(x, params, MAX_ACTION)
    # Tight check vs. a reference that models the intentional bf16 storage.
    assert jnp.allclose(out, ref_bf16, atol=2e-3, rtol=2e-3)
    # Loose check vs. the exact f32 PyTorch-semantics forward.
    assert jnp.allclose(out, ref_f32, atol=3e-2, rtol=3e-2)

    # Larger, awkward batch: exercises the multi-step "parallel" grid with the
    # adaptive tile choice (tb=512, pad_batch=1536 for batch=1030).
    big_batch = 1030
    xb = jax.random.normal(jax.random.PRNGKey(1), (big_batch, STATE_DIM),
                           jnp.float32)
    outb = jax.block_until_ready(
        actor_forward(xb, packed, MAX_ACTION, ACTION_DIM))
    assert outb.shape == (big_batch, ACTION_DIM)
    refb = reference_forward_bf16(xb, params, MAX_ACTION)
    assert jnp.allclose(outb, refb, atol=5e-3, rtol=5e-3)

    print("KERNEL_OK")
</pallas_src>

<mosaic_0001>
module attributes {stable_mosaic.version = 11 : i64} {
  func.func @actor_kernel(%arg0: i32, %arg1: memref<1x1xf32, #tpu.memory_space<smem>>, %arg2: memref<16x128xbf16, #tpu.memory_space<vmem>>, %arg3: memref<640x512xbf16, #tpu.memory_space<vmem>>, %arg4: memref<512x128xbf16, #tpu.memory_space<vmem>>, %arg5: memref<1x1152xf32, #tpu.memory_space<vmem>>, %arg6: memref<16x128xf32, #tpu.memory_space<vmem>>) attributes {dimension_semantics = [#tpu.dimension_semantics<parallel>], iteration_bounds = array<i64: 1>, scalar_prefetch = 0 : i64, scratch_operands = 0 : i64, tpu.core_type = #tpu.core_type<tc>, window_params = [{transform_indices = @transform_0, window_bounds = array<i64: 1, 1>}, {transform_indices = @transform_1, window_bounds = array<i64: 16, 128>}, {pipeline_mode = #tpu.pipeline_mode<synchronous>, transform_indices = @transform_2, window_bounds = array<i64: 640, 512>}, {pipeline_mode = #tpu.pipeline_mode<synchronous>, transform_indices = @transform_3, window_bounds = array<i64: 512, 128>}, {pipeline_mode = #tpu.pipeline_mode<synchronous>, transform_indices = @transform_4, window_bounds = array<i64: 1, 1152>}, {transform_indices = @transform_5, window_bounds = array<i64: 16, 128>}]} {
    %c0 = arith.constant 0 : index
    %c0_0 = arith.constant 0 : index
    %0 = memref.load %arg1[%c0, %c0_0] : memref<1x1xf32, #tpu.memory_space<smem>>
    %c0_1 = arith.constant 0 : index
    %c0_2 = arith.constant 0 : index
    %1 = vector.load %arg2[%c0_1, %c0_2] : memref<16x128xbf16, #tpu.memory_space<vmem>>, vector<16x128xbf16>
    %c0_3 = arith.constant 0 : index
    %c0_4 = arith.constant 0 : index
    %2 = vector.load %arg3[%c0_3, %c0_4] : memref<640x512xbf16, #tpu.memory_space<vmem>>, vector<128x512xbf16>
    %cst = arith.constant dense<0.000000e+00> : vector<16x512xf32>
    %3 = tpu.matmul %1, %2, %cst {dimension_numbers = #tpu.dot_dimension_numbers<[1], [0], [0], [1], [0, 0, 1, 1], [], []>} : vector<16x128xbf16>, vector<128x512xbf16>, vector<16x512xf32> -> vector<16x512xf32>
    %c0_5 = arith.constant 0 : index
    %c0_6 = arith.constant 0 : index
    %4 = vector.load %arg5[%c0_5, %c0_6] : memref<1x1152xf32, #tpu.memory_space<vmem>>, vector<1x512xf32>
    %5 = vector.broadcast %4 : vector<1x512xf32> to vector<16x512xf32>
    %6 = arith.addf %3, %5 : vector<16x512xf32>
    %cst_7 = arith.constant 0.000000e+00 : f32
    %7 = vector.broadcast %cst_7 : f32 to vector<16x512xf32>
    %8 = arith.maximumf %6, %7 : vector<16x512xf32>
    %9 = arith.truncf %8 : vector<16x512xf32> to vector<16x512xbf16>
    %c128 = arith.constant 128 : index
    %c0_8 = arith.constant 0 : index
    %10 = vector.load %arg3[%c128, %c0_8] : memref<640x512xbf16, #tpu.memory_space<vmem>>, vector<512x512xbf16>
    %cst_9 = arith.constant dense<0.000000e+00> : vector<16x512xf32>
    %11 = tpu.matmul %9, %10, %cst_9 {dimension_numbers = #tpu.dot_dimension_numbers<[1], [0], [0], [1], [0, 0, 1, 1], [], []>} : vector<16x512xbf16>, vector<512x512xbf16>, vector<16x512xf32> -> vector<16x512xf32>
    %c0_10 = arith.constant 0 : index
    %c512 = arith.constant 512 : index
    %12 = vector.load %arg5[%c0_10, %c512] : memref<1x1152xf32, #tpu.memory_space<vmem>>, vector<1x512xf32>
    %13 = vector.broadcast %12 : vector<1x512xf32> to vector<16x512xf32>
    %14 = arith.addf %11, %13 : vector<16x512xf32>
    %cst_11 = arith.constant 0.000000e+00 : f32
    %15 = vector.broadcast %cst_11 : f32 to vector<16x512xf32>
    %16 = arith.maximumf %14, %15 : vector<16x512xf32>
    %17 = arith.truncf %16 : vector<16x512xf32> to vector<16x512xbf16>
    %c0_12 = arith.constant 0 : index
    %c0_13 = arith.constant 0 : index
    %18 = vector.load %arg4[%c0_12, %c0_13] : memref<512x128xbf16, #tpu.memory_space<vmem>>, vector<512x128xbf16>
    %cst_14 = arith.constant dense<0.000000e+00> : vector<16x128xf32>
    %19 = tpu.matmul %17, %18, %cst_14 {dimension_numbers = #tpu.dot_dimension_numbers<[1], [0], [0], [1], [0, 0, 1, 1], [], []>} : vector<16x512xbf16>, vector<512x128xbf16>, vector<16x128xf32> -> vector<16x128xf32>
    %c0_15 = arith.constant 0 : index
    %c1024 = arith.constant 1024 : index
    %20 = vector.load %arg5[%c0_15, %c1024] : memref<1x1152xf32, #tpu.memory_space<vmem>>, vector<1x128xf32>
    %21 = vector.broadcast %20 : vector<1x128xf32> to vector<16x128xf32>
    %22 = arith.addf %19, %21 : vector<16x128xf32>
    %23 = math.tanh %22 : vector<16x128xf32>
    %24 = vector.broadcast %0 : f32 to vector<16x128xf32>
    %25 = arith.mulf %24, %23 : vector<16x128xf32>
    %c0_16 = arith.constant 0 : index
    %c0_17 = arith.constant 0 : index
    %26 = vector.load %arg6[%c0_16, %c0_17] : memref<16x128xf32, #tpu.memory_space<vmem>>, vector<16x128xf32>
    tpu.vector_store %arg6[%c0_16, %c0_17], %25 {strides = array<i32>} : memref<16x128xf32, #tpu.memory_space<vmem>>, vector<16x128xf32>,
    return
  }
  func.func @transform_0(%arg0: i32) -> (i32, i32) {
    %c0_i32 = arith.constant 0 : i32
    %c0_i32_0 = arith.constant 0 : i32
    %c0_i32_1 = arith.constant 0 : i32
    return %c0_i32, %c0_i32_0 : i32, i32
  }
  func.func @transform_1(%arg0: i32) -> (i32, i32) {
    %c0_i32 = arith.constant 0 : i32
    %c0_i32_0 = arith.constant 0 : i32
    return %arg0, %c0_i32 : i32, i32
  }
  func.func @transform_2(%arg0: i32) -> (i32, i32) {
    %c0_i32 = arith.constant 0 : i32
    %c0_i32_0 = arith.constant 0 : i32
    %c0_i32_1 = arith.constant 0 : i32
    return %c0_i32, %c0_i32_0 : i32, i32
  }
  func.func @transform_3(%arg0: i32) -> (i32, i32) {
    %c0_i32 = arith.constant 0 : i32
    %c0_i32_0 = arith.constant 0 : i32
    %c0_i32_1 = arith.constant 0 : i32
    return %c0_i32, %c0_i32_0 : i32, i32
  }
  func.func @transform_4(%arg0: i32) -> (i32, i32) {
    %c0_i32 = arith.constant 0 : i32
    %c0_i32_0 = arith.constant 0 : i32
    %c0_i32_1 = arith.constant 0 : i32
    return %c0_i32, %c0_i32_0 : i32, i32
  }
  func.func @transform_5(%arg0: i32) -> (i32, i32) {
    %c0_i32 = arith.constant 0 : i32
    %c0_i32_0 = arith.constant 0 : i32
    return %arg0, %c0_i32 : i32, i32
  }
}

</mosaic_0001>

<bundles_post_ra>
// kernel: tpu_custom_call.1
= control target key start
LH: loop header
LB: loop body
LE: loop exit
PB: predicated region body
PF: predicated region fallthrough
CT: control target
= control target key end

     0   :  { %11 = vsyncpa [#allocation4], 0  ;;  %s2492_s0 = inlined_call_operand.<no memory space> [shape: f32[1,1], index: 0, kind: input, shape index: {}]   ;;  %s2493_s1 = inlined_call_operand.hbm [shape: bf16[16,128], index: 1, kind: input, shape index: {}]   ;;  %s2494_s2 = inlined_call_operand.hbm [shape: bf16[640,512], index: 2, kind: input, shape index: {}]   ;;  %s2495_s3 = inlined_call_operand.hbm [shape: bf16[512,128], index: 3, kind: input, shape index: {}]   ;;  %s2496_s4 = inlined_call_operand.vmem [shape: f32[1,1152], index: 4, kind: input, shape index: {}]   ;;  %s2497_s5 = inlined_call_operand.hbm [shape: f32[16,128], index: 5, kind: output, shape index: {}]  }
   0x1   :  { %12 = vsyncpa [#allocation7], 0 }
   0x2   :  { %13 = vsyncpa [#allocation5], 0  ;;  %s2365_s18 = smov [#allocation6]   ;;  %s2271_s22 = scalar_lea.hbm %s2494_s2, 20480 }
   0x3   :  { %s33_s19 = sshll.u32 %s2365_s18, 4  ;;  %p2272_p0 = scmp.ne.s32.totalorder %s2494_s2, %s2271_s22  ;;  %s34_s19 = int_to_ptr.vmem [resolvable:$true] %s33_s19 }
   0x4   :  { %p2275_p1 = scmp.lt.u32.totalorder %s2271_s22, %s2494_s2 }
   0x6   :  { %p2277_p2 = pnand %p2275_p1, %p2272_p0 }
   0x8   :  { %2280 = shalt.err (!%p2277_p2)
}
   0x9   :  { %s2281_s27 = scalar_lea.vmem %s34_s19, 20480  ;;  %p2286_p4 = scmp.lt.s32.totalorder %s34_s19, %s34_s19 }
   0xa   :  { %p2282_p3 = scmp.ne.s32.totalorder %s34_s19, %s2281_s27  ;;  %p2287_p5 = scmp.lt.s32.totalorder %s2281_s27, %s2281_s27 }
   0xc   :  { %p2288_p6 = por %p2287_p5, %p2286_p4 }
   0xe   :  { %p2289_p7 = pnand %p2288_p6, %p2282_p3 }
  0x10   :  { %2292 = shalt.err (!%p2289_p7)
}
  0x11   :  { %s2366_s28 = smov 256   ;;  %s2367_s29 = smov 16  }
  0x12   :  { %39 = dma.hbm_to_vmem [thread:$0]  %s2494_s2, 20480, %s34_s19, [#allocation7], %s2366_s28, %s2366_s28, %s2367_s29  }
  0x13   :  { %s2368_s7 = smov [#allocation3]   ;;  %s2293_s11 = scalar_lea.hbm %s2493_s1, 128 }
  0x14   :  { %s21_s8 = sshll.u32 %s2368_s7, 4  ;;  %p2294_p8 = scmp.ne.s32.totalorder %s2493_s1, %s2293_s11  ;;  %s22_s8 = int_to_ptr.vmem [resolvable:$true] %s21_s8 }
  0x15   :  { %p2297_p9 = scmp.lt.u32.totalorder %s2293_s11, %s2493_s1 }
  0x17   :  { %p2299_p10 = pnand %p2297_p9, %p2294_p8 }
  0x19   :  { %2302 = shalt.err (!%p2299_p10)
}
  0x1a   :  { %s2303_s16 = scalar_lea.vmem %s22_s8, 128  ;;  %p2308_p12 = scmp.lt.s32.totalorder %s22_s8, %s22_s8 }
  0x1b   :  { %p2304_p11 = scmp.ne.s32.totalorder %s22_s8, %s2303_s16  ;;  %p2309_p13 = scmp.lt.s32.totalorder %s2303_s16, %s2303_s16 }
  0x1d   :  { %p2310_p0 = por %p2309_p13, %p2308_p12 }
  0x1f   :  { %p2311_p1 = pnand %p2310_p0, %p2304_p11 }
  0x21   :  { %2314 = shalt.err (!%p2311_p1)
}
  0x22   :  { %s2369_s2 = smov 64   ;;  %s2370_s17 = smov 4  }
  0x23   :  { %27 = dma.hbm_to_vmem [thread:$0]  %s2493_s1, 128, %s22_s8, [#allocation4], %s2369_s2, %s2369_s2, %s2370_s17  }
  0x24   :  { %s2371_s20 = smov [#allocation8]   ;;  %s2315_s24 = scalar_lea.hbm %s2495_s3, 4096 }
  0x25   :  { %s45_s21 = sshll.u32 %s2371_s20, 4  ;;  %p2316_p2 = scmp.ne.s32.totalorder %s2495_s3, %s2315_s24  ;;  %s46_s21 = int_to_ptr.vmem [resolvable:$true] %s45_s21 }
  0x26   :  { %p2319_p3 = scmp.lt.u32.totalorder %s2315_s24, %s2495_s3 }
  0x28   :  { %p2321_p4 = pnand %p2319_p3, %p2316_p2 }
  0x2a   :  { %2324 = shalt.err (!%p2321_p4)
}
  0x2b   :  { %s2325_s29 = scalar_lea.vmem %s46_s21, 4096  ;;  %p2330_p6 = scmp.lt.s32.totalorder %s46_s21, %s46_s21 }
  0x2c   :  { %p2326_p5 = scmp.ne.s32.totalorder %s46_s21, %s2325_s29  ;;  %p2331_p7 = scmp.lt.s32.totalorder %s2325_s29, %s2325_s29 }
  0x2e   :  { %p2332_p8 = por %p2331_p7, %p2330_p6 }
  0x30   :  { %p2333_p9 = pnand %p2332_p8, %p2326_p5 }
  0x32   :  { %2336 = shalt.err (!%p2333_p9)
}
  0x33   :  { %51 = dma.hbm_to_vmem [thread:$0]  %s2495_s3, 4096, %s46_s21, [#allocation7], %s2369_s2, %s2369_s2, %s2370_s17  }
  0x34   :  { %2359 = dma.done.wait [#allocation4], 128  }
  0x35   :  { %2360 = vsyncadd [#allocation4], 4294967168 }
  0x36   :  { %2361 = dma.done.wait [#allocation7], 24576  }
  0x37   :  { %2362 = vsyncadd [#allocation7], 4294942720  ;;  %v2372_v0 = vmov 0   ;;  %v1994_v1 = vld [vmem:[#allocation6 + $0x4] ss:$16 sps:$4 sm:$0xff]   ;;  %v2018_v29 = vld [vmem:[#allocation3] sm:$0xff]  }
  0x38   :  { %319 = vmatprep.mubr.bf16.mxu0 %v2372_v0  ;;  %362 = vmatprep.mubr.bf16.mxu1 %v2372_v0  ;;  %v1996_v2 = vld [vmem:[#allocation6] ss:$16 sps:$4 sm:$0xff]   ;;  %v1997_v3 = vld [vmem:[#allocation6 + $0x24] ss:$16 sps:$4 sm:$0xff]   ;;  %v2019_v10 = vld [vmem:[#allocation6 + $0xc] ss:$16 sps:$4 sm:$0xff]  }
  0x39   :  { %287 = vmatprep.subr.bf16.mxu0 %v1994_v1  ;;  %v1999_v4 = vld [vmem:[#allocation6 + $0x20] ss:$16 sps:$4 sm:$0xff]   ;;  %v2000_v5 = vld [vmem:[#allocation6 + $0x44] ss:$16 sps:$4 sm:$0xff]   ;;  %v2021_v11 = vld [vmem:[#allocation6 + $0x8] ss:$16 sps:$4 sm:$0xff]   ;;  %330 = vmatprep.subr.bf16.mxu1 %v2019_v10 }
  0x3a   :  { %288 = vmatpush1.bf16.msra.mxu0 %v1996_v2  ;;  %v2002_v6 = vld [vmem:[#allocation6 + $0x40] ss:$16 sps:$4 sm:$0xff]   ;;  %v2003_v7 = vld [vmem:[#allocation6 + $0x64] ss:$16 sps:$4 sm:$0xff]   ;;  %v2022_v12 = vld [vmem:[#allocation6 + $0x2c] ss:$16 sps:$4 sm:$0xff]   ;;  %331 = vmatpush1.bf16.msra.mxu1 %v2021_v11 }
  0x3b   :  { %289 = vmatprep.subr.bf16.mxu0 %v1997_v3  ;;  %v2005_v8 = vld [vmem:[#allocation6 + $0x60] ss:$16 sps:$4 sm:$0xff]   ;;  %v2006_v9 = vld [vmem:[#allocation6 + $0x84] ss:$16 sps:$4 sm:$0xff]   ;;  %v2024_v14 = vld [vmem:[#allocation6 + $0x28] ss:$16 sps:$4 sm:$0xff]   ;;  %332 = vmatprep.subr.bf16.mxu1 %v2022_v12 }
  0x3c   :  { %v2008_v13 = vld [vmem:[#allocation6 + $0x80] ss:$16 sps:$4 sm:$0xff]   ;;  %v2009_v15 = vld [vmem:[#allocation6 + $0xa4] ss:$16 sps:$4 sm:$0xff]   ;;  %v2025_v16 = vld [vmem:[#allocation6 + $0x4c] ss:$16 sps:$4 sm:$0xff]  }
  0x3d   :  { %v2011_v17 = vld [vmem:[#allocation6 + $0xa0] ss:$16 sps:$4 sm:$0xff]   ;;  %v2027_v18 = vld [vmem:[#allocation6 + $0x48] ss:$16 sps:$4 sm:$0xff]   ;;  %v2012_v19 = vld [vmem:[#allocation6 + $0xc4] ss:$16 sps:$4 sm:$0xff]  }
  0x3e   :  { %290 = vmatpush1.bf16.msra.mxu0 %v1999_v4  ;;  %333 = vmatpush1.bf16.msra.mxu1 %v2024_v14  ;;  %v2028_v20 = vld [vmem:[#allocation6 + $0x6c] ss:$16 sps:$4 sm:$0xff]   ;;  %v2014_v21 = vld [vmem:[#allocation6 + $0xc0] ss:$16 sps:$4 sm:$0xff]   ;;  %v2030_v22 = vld [vmem:[#allocation6 + $0x68] ss:$16 sps:$4 sm:$0xff]  }
  0x3f   :  { %291 = vmatprep.subr.bf16.mxu0 %v2000_v5  ;;  %334 = vmatprep.subr.bf16.mxu1 %v2025_v16  ;;  %v2015_v23 = vld [vmem:[#allocation6 + $0xe4] ss:$16 sps:$4 sm:$0xff]   ;;  %v2031_v24 = vld [vmem:[#allocation6 + $0x8c] ss:$16 sps:$4 sm:$0xff]   ;;  %v2017_v25 = vld [vmem:[#allocation6 + $0xe0] ss:$16 sps:$4 sm:$0xff]  }
  0x40   :  { %v2033_v26 = vld [vmem:[#allocation6 + $0x88] ss:$16 sps:$4 sm:$0xff]   ;;  %v2034_v27 = vld [vmem:[#allocation6 + $0xac] ss:$16 sps:$4 sm:$0xff]   ;;  %v2045_v28 = vld [vmem:[#allocation6 + $0x104] ss:$16 sps:$4 sm:$0xff]  }
  0x41   :  { %v2036_v30 = vld [vmem:[#allocation6 + $0xa8] ss:$16 sps:$4 sm:$0xff]   ;;  %v2043_v31 = vld [vmem:[#allocation6 + $0x100] ss:$16 sps:$4 sm:$0xff]   ;;  %v2037_v32 = vld [vmem:[#allocation6 + $0xcc] ss:$16 sps:$4 sm:$0xff]  }
  0x42   :  { %292 = vmatpush1.bf16.msra.mxu0 %v2002_v6  ;;  %335 = vmatpush1.bf16.msra.mxu1 %v2027_v18  ;;  %v2051_v33 = vld [vmem:[#allocation6 + $0x124] ss:$16 sps:$4 sm:$0xff]   ;;  %v2039_v34 = vld [vmem:[#allocation6 + $0xc8] ss:$16 sps:$4 sm:$0xff]   ;;  %v2049_v35 = vld [vmem:[#allocation6 + $0x120] ss:$16 sps:$4 sm:$0xff]  }
  0x43   :  { %293 = vmatprep.subr.bf16.mxu0 %v2003_v7  ;;  %336 = vmatprep.subr.bf16.mxu1 %v2028_v20  ;;  %v2040_v36 = vld [vmem:[#allocation6 + $0xec] ss:$16 sps:$4 sm:$0xff]   ;;  %v2057_v37 = vld [vmem:[#allocation6 + $0x144] ss:$16 sps:$4 sm:$0xff]   ;;  %v2042_v38 = vld [vmem:[#allocation6 + $0xe8] ss:$16 sps:$4 sm:$0xff]  }
  0x44   :  { %v2055_v39 = vld [vmem:[#allocation6 + $0x140] ss:$16 sps:$4 sm:$0xff]   ;;  %v2048_v40 = vld [vmem:[#allocation6 + $0x10c] ss:$16 sps:$4 sm:$0xff]   ;;  %v2063_v41 = vld [vmem:[#allocation6 + $0x164] ss:$16 sps:$4 sm:$0xff]  }
  0x45   :  { %v2046_v42 = vld [vmem:[#allocation6 + $0x108] ss:$16 sps:$4 sm:$0xff]   ;;  %v2061_v43 = vld [vmem:[#allocation6 + $0x160] ss:$16 sps:$4 sm:$0xff]   ;;  %v2054_v44 = vld [vmem:[#allocation6 + $0x12c] ss:$16 sps:$4 sm:$0xff]  }
  0x46   :  { %294 = vmatpush1.bf16.msra.mxu0 %v2005_v8  ;;  %337 = vmatpush1.bf16.msra.mxu1 %v2030_v22  ;;  %v2069_v45 = vld [vmem:[#allocation6 + $0x184] ss:$16 sps:$4 sm:$0xff]   ;;  %v2052_v46 = vld [vmem:[#allocation6 + $0x128] ss:$16 sps:$4 sm:$0xff]   ;;  %v2067_v47 = vld [vmem:[#allocation6 + $0x180] ss:$16 sps:$4 sm:$0xff]  }
  0x47   :  { %295 = vmatprep.subr.bf16.mxu0 %v2006_v9  ;;  %338 = vmatprep.subr.bf16.mxu1 %v2031_v24  ;;  %v2060_v48 = vld [vmem:[#allocation6 + $0x14c] ss:$16 sps:$4 sm:$0xff]   ;;  %v2075_v49 = vld [vmem:[#allocation6 + $0x1a4] ss:$16 sps:$4 sm:$0xff]   ;;  %v2058_v50 = vld [vmem:[#allocation6 + $0x148] ss:$16 sps:$4 sm:$0xff]  }
  0x48   :  { %v2073_v51 = vld [vmem:[#allocation6 + $0x1a0] ss:$16 sps:$4 sm:$0xff]   ;;  %v2066_v52 = vld [vmem:[#allocation6 + $0x16c] ss:$16 sps:$4 sm:$0xff]   ;;  %v2081_v53 = vld [vmem:[#allocation6 + $0x1c4] ss:$16 sps:$4 sm:$0xff]  }
  0x49   :  { %v2064_v54 = vld [vmem:[#allocation6 + $0x168] ss:$16 sps:$4 sm:$0xff]   ;;  %v2079_v55 = vld [vmem:[#allocation6 + $0x1c0] ss:$16 sps:$4 sm:$0xff]   ;;  %v2072_v56 = vld [vmem:[#allocation6 + $0x18c] ss:$16 sps:$4 sm:$0xff]  }
  0x4a   :  { %296 = vmatpush1.bf16.msra.mxu0 %v2008_v13  ;;  %339 = vmatpush1.bf16.msra.mxu1 %v2033_v26  ;;  %v2087_v57 = vld [vmem:[#allocation6 + $0x1e4] ss:$16 sps:$4 sm:$0xff]   ;;  %v2070_v58 = vld [vmem:[#allocation6 + $0x188] ss:$16 sps:$4 sm:$0xff]   ;;  %v2078_v59 = vld [vmem:[#allocation6 + $0x1ac] ss:$16 sps:$4 sm:$0xff]  }
  0x4b   :  { %297 = vmatprep.subr.bf16.mxu0 %v2009_v15  ;;  %340 = vmatprep.subr.bf16.mxu1 %v2034_v27  ;;  %v2085_v60 = vld [vmem:[#allocation6 + $0x1e0] ss:$16 sps:$4 sm:$0xff]   ;;  %v2093_v61 = vld [vmem:[#allocation6 + $0x204] ss:$16 sps:$4 sm:$0xff]   ;;  %v2076_v62 = vld [vmem:[#allocation6 + $0x1a8] ss:$16 sps:$4 sm:$0xff]  }
  0x4c   :  { %v2091_v63 = vld [vmem:[#allocation6 + $0x200] ss:$16 sps:$4 sm:$0xff]   ;;  %v2084_v0 = vld [vmem:[#allocation6 + $0x1cc] ss:$16 sps:$4 sm:$0xff]   ;;  %v2099_v1 = vld [vmem:[#allocation6 + $0x224] ss:$16 sps:$4 sm:$0xff]  }
  0x4d   :  { %v2082_v2 = vld [vmem:[#allocation6 + $0x1c8] ss:$16 sps:$4 sm:$0xff]   ;;  %v2097_v3 = vld [vmem:[#allocation6 + $0x220] ss:$16 sps:$4 sm:$0xff]   ;;  %v2090_v4 = vld [vmem:[#allocation6 + $0x1ec] ss:$16 sps:$4 sm:$0xff]  }
  0x4e   :  { %298 = vmatpush1.bf16.msra.mxu0 %v2011_v17  ;;  %341 = vmatpush1.bf16.msra.mxu1 %v2036_v30  ;;  %v2105_v5 = vld [vmem:[#allocation6 + $0x244] ss:$16 sps:$4 sm:$0xff]   ;;  %v2088_v6 = vld [vmem:[#allocation6 + $0x1e8] ss:$16 sps:$4 sm:$0xff]   ;;  %v2103_v7 = vld [vmem:[#allocation6 + $0x240] ss:$16 sps:$4 sm:$0xff]  }
  0x4f   :  { %299 = vmatprep.subr.bf16.mxu0 %v2012_v19  ;;  %342 = vmatprep.subr.bf16.mxu1 %v2037_v32  ;;  %v2096_v8 = vld [vmem:[#allocation6 + $0x20c] ss:$16 sps:$4 sm:$0xff]   ;;  %v2111_v9 = vld [vmem:[#allocation6 + $0x264] ss:$16 sps:$4 sm:$0xff]   ;;  %v2094_v10 = vld [vmem:[#allocation6 + $0x208] ss:$16 sps:$4 sm:$0xff]  }
  0x50   :  { %v2109_v11 = vld [vmem:[#allocation6 + $0x260] ss:$16 sps:$4 sm:$0xff]   ;;  %v2102_v12 = vld [vmem:[#allocation6 + $0x22c] ss:$16 sps:$4 sm:$0xff]   ;;  %v2117_v13 = vld [vmem:[#allocation6 + $0x284] ss:$16 sps:$4 sm:$0xff]  }
  0x51   :  { %v2100_v14 = vld [vmem:[#allocation6 + $0x228] ss:$16 sps:$4 sm:$0xff]   ;;  %v2115_v15 = vld [vmem:[#allocation6 + $0x280] ss:$16 sps:$4 sm:$0xff]   ;;  %v2108_v16 = vld [vmem:[#allocation6 + $0x24c] ss:$16 sps:$4 sm:$0xff]  }
  0x52   :  { %300 = vmatpush1.bf16.msra.mxu0 %v2014_v21  ;;  %343 = vmatpush1.bf16.msra.mxu1 %v2039_v34  ;;  %v2123_v17 = vld [vmem:[#allocation6 + $0x2a4] ss:$16 sps:$4 sm:$0xff]   ;;  %v2106_v18 = vld [vmem:[#allocation6 + $0x248] ss:$16 sps:$4 sm:$0xff]   ;;  %v2121_v19 = vld [vmem:[#allocation6 + $0x2a0] ss:$16 sps:$4 sm:$0xff]  }
  0x53   :  { %301 = vmatprep.subr.bf16.mxu0 %v2015_v23  ;;  %344 = vmatprep.subr.bf16.mxu1 %v2040_v36  ;;  %v2114_v20 = vld [vmem:[#allocation6 + $0x26c] ss:$16 sps:$4 sm:$0xff]   ;;  %v2112_v21 = vld [vmem:[#allocation6 + $0x268] ss:$16 sps:$4 sm:$0xff]   ;;  %v2129_v26 = vld [vmem:[#allocation6 + $0x2c4] ss:$16 sps:$4 sm:$0xff]   ;;  %v101_v36 = vlaneseq }
  0x54   :  { %v2120_v22 = vld [vmem:[#allocation6 + $0x28c] ss:$16 sps:$4 sm:$0xff]   ;;  %v2118_v23 = vld [vmem:[#allocation6 + $0x288] ss:$16 sps:$4 sm:$0xff]   ;;  %v2135_v30 = vld [vmem:[#allocation6 + $0x2e4] ss:$16 sps:$4 sm:$0xff]  }
  0x55   :  { %v2126_v24 = vld [vmem:[#allocation6 + $0x2ac] ss:$16 sps:$4 sm:$0xff]   ;;  %v2133_v32 = vld [vmem:[#allocation6 + $0x2e0] ss:$16 sps:$4 sm:$0xff]   ;;  %v2141_v34 = vld [vmem:[#allocation6 + $0x304] ss:$16 sps:$4 sm:$0xff]  }
  0x56   :  { %302 = vmatpush1.bf16.msra.mxu0 %v2017_v25  ;;  %345 = vmatpush1.bf16.msra.mxu1 %v2042_v38  ;;  %v2124_v25 = vld [vmem:[#allocation6 + $0x2a8] ss:$16 sps:$4 sm:$0xff]   ;;  %v2132_v27 = vld [vmem:[#allocation6 + $0x2cc] ss:$16 sps:$4 sm:$0xff]  }
  0x57   :  { %1175 = vmatprep.subr.bf16.mxu0 %v2045_v28  ;;  %1261 = vmatprep.subr.bf16.mxu1 %v2048_v40  ;;  %v2127_v28 = vld [vmem:[#allocation6 + $0x2c0] ss:$16 sps:$4 sm:$0xff]  }
  0x59   :  { %320 = vmatmul.mubr.bf16.vlgmr.msra.gmra.mrb[0].mxu0 %v2018_v29  ;;  %363 = vmatmul.mubr.bf16.vlgmr.msra.gmra.mrb[0].mxu1 %v2018_v29  ;;  %v2130_v29 = vld [vmem:[#allocation6 + $0x2c8] ss:$16 sps:$4 sm:$0xff]  }
  0x5a   :  { %1176 = vmatpush1.bf16.msra.mxu0 %v2043_v31  ;;  %1262 = vmatpush1.bf16.msra.mxu1 %v2046_v42  ;;  %v2138_v31 = vld [vmem:[#allocation6 + $0x2ec] ss:$16 sps:$4 sm:$0xff]  }
  0x5b   :  { %1177 = vmatprep.subr.bf16.mxu0 %v2051_v33  ;;  %1263 = vmatprep.subr.bf16.mxu1 %v2054_v44  ;;  %v2136_v33 = vld [vmem:[#allocation6 + $0x2e8] ss:$16 sps:$4 sm:$0xff]  }
  0x5e   :  { %1178 = vmatpush1.bf16.msra.mxu0 %v2049_v35  ;;  %1264 = vmatpush1.bf16.msra.mxu1 %v2052_v46  ;;  %v2144_v35 = vld [vmem:[#allocation6 + $0x30c] ss:$16 sps:$4 sm:$0xff]  }
  0x5f   :  { %1179 = vmatprep.subr.bf16.mxu0 %v2057_v37  ;;  %1265 = vmatprep.subr.bf16.mxu1 %v2060_v48  ;;  %v2442_v37 = vshrl.u32 %v101_v36, 7  ;;  %v2178_v36 = vld [vmem:[#allocation6 + $0x3c8] ss:$16 sps:$4 sm:$0xff]  }
  0x61   :  { %v103_v38 = vsub.s32 0, %v2442_v37  ;;  %v107_v40 = vsub.s32 1, %v2442_v37 }
  0x62   :  { %1180 = vmatpush1.bf16.msra.mxu0 %v2055_v39  ;;  %1266 = vmatpush1.bf16.msra.mxu1 %v2058_v50  ;;  %v99_v39 = vld [vmem:[%s2496_s4] sm:$0xf] }
  0x63   :  { %1181 = vmatprep.subr.bf16.mxu0 %v2063_v41  ;;  %1267 = vmatprep.subr.bf16.mxu1 %v2066_v52  ;;  %v104_v41 = vrot.slane %v99_v39, %v103_v38  ;;  %v108_v42 = vrot.slane %v99_v39, %v107_v40 }
  0x66   :  { %1182 = vmatpush1.bf16.msra.mxu0 %v2061_v43  ;;  %1268 = vmatpush1.bf16.msra.mxu1 %v2064_v54 }
  0x67   :  { %1183 = vmatprep.subr.bf16.mxu0 %v2069_v45  ;;  %1269 = vmatprep.subr.bf16.mxu1 %v2072_v56  ;;  %v115_v56 = vsub.s32 3, %v2442_v37 }
  0x6a   :  { %1184 = vmatpush1.bf16.msra.mxu0 %v2067_v47  ;;  %1270 = vmatpush1.bf16.msra.mxu1 %v2070_v58 }
  0x6b   :  { %1185 = vmatprep.subr.bf16.mxu0 %v2075_v49  ;;  %1271 = vmatprep.subr.bf16.mxu1 %v2078_v59  ;;  %v2139_v59 = vld [vmem:[#allocation6 + $0x300] ss:$16 sps:$4 sm:$0xff]  }
  0x6e   :  { %1186 = vmatpush1.bf16.msra.mxu0 %v2073_v51  ;;  %1272 = vmatpush1.bf16.msra.mxu1 %v2076_v62  ;;  %v2150_v62 = vld [vmem:[#allocation6 + $0x32c] ss:$16 sps:$4 sm:$0xff]  }
  0x6f   :  { %1187 = vmatprep.subr.bf16.mxu0 %v2081_v53  ;;  %1273 = vmatprep.subr.bf16.mxu1 %v2084_v0  ;;  %v111_v53 = vsub.s32 2, %v2442_v37  ;;  %v116_v0 = vrot.slane %v99_v39, %v115_v56 }
  0x72   :  { %1188 = vmatpush1.bf16.msra.mxu0 %v2079_v55  ;;  %1274 = vmatpush1.bf16.msra.mxu1 %v2082_v2  ;;  %v2148_v2 = vld [vmem:[#allocation6 + $0x328] ss:$16 sps:$4 sm:$0xff]  }
  0x73   :  { %1189 = vmatprep.subr.bf16.mxu0 %v2087_v57  ;;  %1275 = vmatprep.subr.bf16.mxu1 %v2090_v4  ;;  %v2153_v4 = vld [vmem:[#allocation6 + $0x344] ss:$16 sps:$4 sm:$0xff]  }
  0x76   :  { %1190 = vmatpush1.bf16.msra.mxu0 %v2085_v60  ;;  %1276 = vmatpush1.bf16.msra.mxu1 %v2088_v6  ;;  %v2142_v60 = vld [vmem:[#allocation6 + $0x308] ss:$16 sps:$4 sm:$0xff]  }
  0x77   :  { %1191 = vmatprep.subr.bf16.mxu0 %v2093_v61  ;;  %1277 = vmatprep.subr.bf16.mxu1 %v2096_v8  ;;  %v2147_v61 = vld [vmem:[#allocation6 + $0x324] ss:$16 sps:$4 sm:$0xff]  }
  0x7a   :  { %1192 = vmatpush1.bf16.msra.mxu0 %v2091_v63  ;;  %1278 = vmatpush1.bf16.msra.mxu1 %v2094_v10  ;;  %v112_v63 = vrot.slane %v99_v39, %v111_v53  ;;  %v2183_v39 = vld [vmem:[#allocation6 + $0x3e4] ss:$16 sps:$4 sm:$0xff]  }
  0x7b   :  { %1193 = vmatprep.subr.bf16.mxu0 %v2099_v1  ;;  %1279 = vmatprep.subr.bf16.mxu1 %v2102_v12  ;;  %v2145_v1 = vld [vmem:[#allocation6 + $0x320] ss:$16 sps:$4 sm:$0xff]  }
  0x7e   :  { %1194 = vmatpush1.bf16.msra.mxu0 %v2097_v3  ;;  %1280 = vmatpush1.bf16.msra.mxu1 %v2100_v14  ;;  %v2154_v14 = vld [vmem:[#allocation6 + $0x348] ss:$16 sps:$4 sm:$0xff]  }
  0x7f   :  { %1195 = vmatprep.subr.bf16.mxu0 %v2105_v5  ;;  %1281 = vmatprep.subr.bf16.mxu1 %v2108_v16  ;;  %v2156_v5 = vld [vmem:[#allocation6 + $0x34c] ss:$16 sps:$4 sm:$0xff]  }
  0x82   :  { %1196 = vmatpush1.bf16.msra.mxu0 %v2103_v7  ;;  %1282 = vmatpush1.bf16.msra.mxu1 %v2106_v18  ;;  %v2162_v18 = vld [vmem:[#allocation6 + $0x36c] ss:$16 sps:$4 sm:$0xff]  }
  0x83   :  { %1197 = vmatprep.subr.bf16.mxu0 %v2111_v9  ;;  %1283 = vmatprep.subr.bf16.mxu1 %v2114_v20 }
  0x86   :  { %1198 = vmatpush1.bf16.msra.mxu0 %v2109_v11  ;;  %1284 = vmatpush1.bf16.msra.mxu1 %v2112_v21 }
  0x87   :  { %1199 = vmatprep.subr.bf16.mxu0 %v2117_v13  ;;  %1285 = vmatprep.subr.bf16.mxu1 %v2120_v22  ;;  %v2151_v13 = vld [vmem:[#allocation6 + $0x340] ss:$16 sps:$4 sm:$0xff]  }
  0x88   :  { %v2157_v22 = vld [vmem:[#allocation6 + $0x360] ss:$16 sps:$4 sm:$0xff]  }
  0x8a   :  { %1200 = vmatpush1.bf16.msra.mxu0 %v2115_v15  ;;  %1286 = vmatpush1.bf16.msra.mxu1 %v2118_v23  ;;  %v2160_v23 = vld [vmem:[#allocation6 + $0x368] ss:$16 sps:$4 sm:$0xff]  }
  0x8b   :  { %1201 = vmatprep.subr.bf16.mxu0 %v2123_v17  ;;  %1287 = vmatprep.subr.bf16.mxu1 %v2126_v24  ;;  %v2159_v17 = vld [vmem:[#allocation6 + $0x364] ss:$16 sps:$4 sm:$0xff]  }
  0x8e   :  { %1202 = vmatpush1.bf16.msra.mxu0 %v2121_v19  ;;  %1288 = vmatpush1.bf16.msra.mxu1 %v2124_v25  ;;  %v2165_v25 = vld [vmem:[#allocation6 + $0x384] ss:$16 sps:$4 sm:$0xff]  }
  0x8f   :  { %1203 = vmatprep.subr.bf16.mxu0 %v2129_v26  ;;  %1289 = vmatprep.subr.bf16.mxu1 %v2132_v27  ;;  %v2168_v26 = vld [vmem:[#allocation6 + $0x38c] ss:$16 sps:$4 sm:$0xff]   ;;  %v2163_v27 = vld [vmem:[#allocation6 + $0x380] ss:$16 sps:$4 sm:$0xff]  }
  0x92   :  { %1204 = vmatpush1.bf16.msra.mxu0 %v2127_v28  ;;  %1290 = vmatpush1.bf16.msra.mxu1 %v2130_v29  ;;  %v2166_v28 = vld [vmem:[#allocation6 + $0x388] ss:$16 sps:$4 sm:$0xff]   ;;  %v2171_v29 = vld [vmem:[#allocation6 + $0x3a4] ss:$16 sps:$4 sm:$0xff]  }
  0x93   :  { %1205 = vmatprep.subr.bf16.mxu0 %v2135_v30  ;;  %1291 = vmatprep.subr.bf16.mxu1 %v2138_v31  ;;  %v2174_v30 = vld [vmem:[#allocation6 + $0x3ac] ss:$16 sps:$4 sm:$0xff]   ;;  %v2169_v31 = vld [vmem:[#allocation6 + $0x3a0] ss:$16 sps:$4 sm:$0xff]  }
  0x96   :  { %1206 = vmatpush1.bf16.msra.mxu0 %v2133_v32  ;;  %1292 = vmatpush1.bf16.msra.mxu1 %v2136_v33  ;;  %v2172_v32 = vld [vmem:[#allocation6 + $0x3a8] ss:$16 sps:$4 sm:$0xff]   ;;  %v2177_v33 = vld [vmem:[#allocation6 + $0x3c4] ss:$16 sps:$4 sm:$0xff]  }
  0x97   :  { %1218 = vmatprep.subr.bf16.mxu0 %v2141_v34  ;;  %1304 = vmatprep.subr.bf16.mxu1 %v2144_v35  ;;  %v2180_v34 = vld [vmem:[#allocation6 + $0x3cc] ss:$16 sps:$4 sm:$0xff]   ;;  %v2175_v35 = vld [vmem:[#allocation6 + $0x3c0] ss:$16 sps:$4 sm:$0xff]  }
 0x12c   :  { %v321_v43 = vpop.f32.mrb[0].mxu0  ;;  %v364_v3 = vpop.f32.mrb[0].mxu1 }
 0x12d   :  { %v322_v44 = vadd.f32 %v321_v43, %v104_v41  ;;  %v323_v45 = vpop.f32.mrb[1].mxu0  ;;  %v365_v6 = vadd.f32 %v364_v3, %v112_v63  ;;  %v366_v7 = vpop.f32.mrb[1].mxu1  ;;  %v2184_v43 = vld [vmem:[#allocation6 + $0x3e8] ss:$16 sps:$4 sm:$0xff]   ;;  %v2222_v3 = vld [vmem:[#allocation6 + $0x4ac] ss:$16 sps:$4 sm:$0xff]  }
 0x12e   :  { %v324_v46 = vadd.f32 %v323_v45, %v108_v42  ;;  %v325_v47 = vpop.f32.mrb[2].mxu0  ;;  %v367_v8 = vadd.f32 %v366_v7, %v116_v0  ;;  %v368_v9 = vpop.f32.mrb[2].mxu1  ;;  %v2192_v45 = vld [vmem:[#allocation6 + $0x40c] ss:$16 sps:$4 sm:$0xff]  }
 0x12f   :  { %v326_v48 = vadd.f32 %v325_v47, %v104_v41  ;;  %v327_v49 = vpop.f32.mrb[3].mxu0  ;;  %v373_v51 = vmax.f32 %v322_v44, 0.0  ;;  %v375_v10 = vmax.f32 %v365_v6, 0.0  ;;  %v369_v11 = vadd.f32 %v368_v9, %v112_v63  ;;  %v370_v12 = vpop.f32.mrb[3].mxu1  ;;  %v2186_v41 = vld [vmem:[#allocation6 + $0x3ec] ss:$16 sps:$4 sm:$0xff]  }
 0x130   :  { %v328_v50 = vadd.f32 %v327_v49, %v108_v42  ;;  %v374_v54 = vmax.f32 %v324_v46, 0.0  ;;  %v376_v15 = vmax.f32 %v367_v8, 0.0  ;;  %v371_v16 = vadd.f32 %v370_v12, %v116_v0  ;;  %v2181_v42 = vld [vmem:[#allocation6 + $0x3e0] ss:$16 sps:$4 sm:$0xff]   ;;  %v2189_v44 = vld [vmem:[#allocation6 + $0x404] ss:$16 sps:$4 sm:$0xff]  }
 0x131   :  { %v377_v52 = vmax.f32 %v326_v48, 0.0  ;;  %v379_v19 = vmax.f32 %v369_v11, 0.0  ;;  %v2187_v46 = vld [vmem:[#allocation6 + $0x400] ss:$16 sps:$4 sm:$0xff]   ;;  %v2190_v47 = vld [vmem:[#allocation6 + $0x408] ss:$16 sps:$4 sm:$0xff]  }
 0x132   :  { %v378_v55 = vmax.f32 %v328_v50, 0.0  ;;  %v380_v20 = vmax.f32 %v371_v16, 0.0  ;;  %v2195_v48 = vld [vmem:[#allocation6 + $0x424] ss:$16 sps:$4 sm:$0xff]   ;;  %v2198_v49 = vld [vmem:[#allocation6 + $0x42c] ss:$16 sps:$4 sm:$0xff]  }
 0x133   :  { %v381_v57 = vpack.c.bf16 %v377_v52, %v373_v51  ;;  %v2459_v21 = vpack.c.bf16 %v379_v19, %v375_v10  ;;  %v2193_v50 = vld [vmem:[#allocation6 + $0x420] ss:$16 sps:$4 sm:$0xff]   ;;  %v2196_v51 = vld [vmem:[#allocation6 + $0x428] ss:$16 sps:$4 sm:$0xff]   ;;  %v2201_v52 = vld [vmem:[#allocation6 + $0x444] ss:$16 sps:$4 sm:$0xff]  }
 0x134   :  { %v382_v58 = vpack.c.bf16 %v378_v55, %v374_v54  ;;  %v384_v24 = vpack.c.bf16 %v380_v20, %v376_v15  ;;  %v2204_v54 = vld [vmem:[#allocation6 + $0x44c] ss:$16 sps:$4 sm:$0xff]   ;;  %v2199_v55 = vld [vmem:[#allocation6 + $0x440] ss:$16 sps:$4 sm:$0xff]   ;;  %v2225_v6 = vld [vmem:[#allocation6 + $0x4c4] ss:$16 sps:$4 sm:$0xff]  }
 0x135   :  { %v2216_v63 = vld [vmem:[#allocation6 + $0x48c] ss:$16 sps:$4 sm:$0xff]   ;;  %v2211_v0 = vld [vmem:[#allocation6 + $0x480] ss:$16 sps:$4 sm:$0xff]   ;;  %v2226_v9 = vld [vmem:[#allocation6 + $0x4c8] ss:$16 sps:$4 sm:$0xff]  }
 0x136   :  { %1207 = vmatprep.mubr.bf16.mxu0 %v382_v58  ;;  %1293 = vmatprep.mubr.bf16.mxu1 %v382_v58  ;;  %v2207_v58 = vld [vmem:[#allocation6 + $0x464] ss:$16 sps:$4 sm:$0xff]   ;;  %v2228_v7 = vld [vmem:[#allocation6 + $0x4cc] ss:$16 sps:$4 sm:$0xff]   ;;  %v2223_v8 = vld [vmem:[#allocation6 + $0x4c0] ss:$16 sps:$4 sm:$0xff]  }
 0x137   :  { %1208 = vmatmul.mubr.bf16.vlgmr.msra.gmra.mrb[4].mxu0 %v381_v57  ;;  %1294 = vmatmul.mubr.bf16.vlgmr.msra.gmra.mrb[4].mxu1 %v381_v57  ;;  %v2202_v57 = vld [vmem:[#allocation6 + $0x448] ss:$16 sps:$4 sm:$0xff]   ;;  %v2231_v10 = vld [vmem:[#allocation6 + $0x4e4] ss:$16 sps:$4 sm:$0xff]   ;;  %v2234_v11 = vld [vmem:[#allocation6 + $0x4ec] ss:$16 sps:$4 sm:$0xff]  }
 0x138   :  { %1219 = vmatpush1.bf16.msra.mxu0 %v2139_v59  ;;  %1305 = vmatpush1.bf16.msra.mxu1 %v2142_v60  ;;  %v2210_v59 = vld [vmem:[#allocation6 + $0x46c] ss:$16 sps:$4 sm:$0xff]   ;;  %v2205_v60 = vld [vmem:[#allocation6 + $0x460] ss:$16 sps:$4 sm:$0xff]  }
 0x139   :  { %1220 = vmatprep.subr.bf16.mxu0 %v2147_v61  ;;  %1306 = vmatprep.subr.bf16.mxu1 %v2150_v62  ;;  %v2208_v61 = vld [vmem:[#allocation6 + $0x468] ss:$16 sps:$4 sm:$0xff]   ;;  %v2213_v62 = vld [vmem:[#allocation6 + $0x484] ss:$16 sps:$4 sm:$0xff]   ;;  %v2229_v12 = vld [vmem:[#allocation6 + $0x4e0] ss:$16 sps:$4 sm:$0xff]  }
 0x13a   :  { %1250 = vmatprep.mubr.bf16.mxu0 %v384_v24  ;;  %1336 = vmatprep.mubr.bf16.mxu1 %v384_v24  ;;  %v2236_v15 = vld [vmem:[#allocation8 + $0xc0] sm:$0xff]   ;;  %v2240_v19 = vld [vmem:[#allocation8 + $0xc8] sm:$0xff]   ;;  %v2244_v24 = vld [vmem:[#allocation8 + $0xd0] sm:$0xff]  }
 0x13b   :  { %v2237_v16 = vld [vmem:[#allocation8] sm:$0xff]   ;;  %v2241_v20 = vld [vmem:[#allocation8 + $0x8] sm:$0xff]  }
 0x13c   :  { %1221 = vmatpush1.bf16.msra.mxu0 %v2145_v1  ;;  %1307 = vmatpush1.bf16.msra.mxu1 %v2148_v2  ;;  %v2214_v1 = vld [vmem:[#allocation6 + $0x488] ss:$16 sps:$4 sm:$0xff]   ;;  %v2219_v2 = vld [vmem:[#allocation6 + $0x4a4] ss:$16 sps:$4 sm:$0xff]  }
 0x13d   :  { %1222 = vmatprep.subr.bf16.mxu0 %v2153_v4  ;;  %1308 = vmatprep.subr.bf16.mxu1 %v2156_v5  ;;  %v2217_v4 = vld [vmem:[#allocation6 + $0x4a0] ss:$16 sps:$4 sm:$0xff]   ;;  %v2220_v5 = vld [vmem:[#allocation6 + $0x4a8] ss:$16 sps:$4 sm:$0xff]  }
 0x140   :  { %1223 = vmatpush1.bf16.msra.mxu0 %v2151_v13  ;;  %1309 = vmatpush1.bf16.msra.mxu1 %v2154_v14  ;;  %v2232_v13 = vld [vmem:[#allocation6 + $0x4e8] ss:$16 sps:$4 sm:$0xff]   ;;  %v2235_v14 = vld [vmem:[#allocation8 + $0x40] sm:$0xff]  }
 0x141   :  { %1224 = vmatprep.subr.bf16.mxu0 %v2159_v17  ;;  %1310 = vmatprep.subr.bf16.mxu1 %v2162_v18  ;;  %v2238_v17 = vld [vmem:[#allocation8 + $0x80] sm:$0xff]   ;;  %v2239_v18 = vld [vmem:[#allocation8 + $0x48] sm:$0xff]  }
 0x144   :  { %1225 = vmatpush1.bf16.msra.mxu0 %v2157_v22  ;;  %1311 = vmatpush1.bf16.msra.mxu1 %v2160_v23  ;;  %v2242_v22 = vld [vmem:[#allocation8 + $0x88] sm:$0xff]   ;;  %v2243_v23 = vld [vmem:[#allocation8 + $0x50] sm:$0xff]  }
 0x145   :  { %1226 = vmatprep.subr.bf16.mxu0 %v2165_v25  ;;  %1312 = vmatprep.subr.bf16.mxu1 %v2168_v26  ;;  %v2245_v25 = vld [vmem:[#allocation8 + $0x10] sm:$0xff]  }
 0x146   :  { %v2246_v26 = vld [vmem:[#allocation8 + $0x90] sm:$0xff]  }
 0x148   :  { %1227 = vmatpush1.bf16.msra.mxu0 %v2163_v27  ;;  %1313 = vmatpush1.bf16.msra.mxu1 %v2166_v28  ;;  %v2247_v27 = vld [vmem:[#allocation8 + $0x58] sm:$0xff]  }
 0x149   :  { %1228 = vmatprep.subr.bf16.mxu0 %v2171_v29  ;;  %1314 = vmatprep.subr.bf16.mxu1 %v2174_v30  ;;  %v2248_v28 = vld [vmem:[#allocation8 + $0xd8] sm:$0xff]   ;;  %v2251_v30 = vld [vmem:[#allocation8 + $0x60] sm:$0xff]  }
 0x14a   :  { %v2249_v29 = vld [vmem:[#allocation8 + $0x18] sm:$0xff]  }
 0x14c   :  { %1229 = vmatpush1.bf16.msra.mxu0 %v2169_v31  ;;  %1315 = vmatpush1.bf16.msra.mxu1 %v2172_v32  ;;  %v2252_v31 = vld [vmem:[#allocation8 + $0xe0] sm:$0xff]  }
 0x14d   :  { %1230 = vmatprep.subr.bf16.mxu0 %v2177_v33  ;;  %1316 = vmatprep.subr.bf16.mxu1 %v2180_v34  ;;  %v2253_v32 = vld [vmem:[#allocation8 + $0x20] sm:$0xff]   ;;  %v2255_v34 = vld [vmem:[#allocation8 + $0x68] sm:$0xff]  }
 0x14e   :  { %v2254_v33 = vld [vmem:[#allocation8 + $0xa0] sm:$0xff]  }
 0x150   :  { %1231 = vmatpush1.bf16.msra.mxu0 %v2175_v35  ;;  %1317 = vmatpush1.bf16.msra.mxu1 %v2178_v36  ;;  %v2256_v35 = vld [vmem:[#allocation8 + $0xe8] sm:$0xff]  }
 0x151   :  { %1232 = vmatprep.subr.bf16.mxu0 %v2183_v39  ;;  %1318 = vmatprep.subr.bf16.mxu1 %v2186_v41  ;;  %v2257_v36 = vld [vmem:[#allocation8 + $0x28] sm:$0xff]   ;;  %v2259_v41 = vld [vmem:[#allocation8 + $0x70] sm:$0xff]  }
 0x152   :  { %v2258_v39 = vld [vmem:[#allocation8 + $0xa8] sm:$0xff]  }
 0x154   :  { %1233 = vmatpush1.bf16.msra.mxu0 %v2181_v42  ;;  %1319 = vmatpush1.bf16.msra.mxu1 %v2184_v43  ;;  %v2260_v42 = vld [vmem:[#allocation8 + $0xf0] sm:$0xff]  }
 0x155   :  { %1234 = vmatprep.subr.bf16.mxu0 %v2189_v44  ;;  %1320 = vmatprep.subr.bf16.mxu1 %v2192_v45  ;;  %v2261_v43 = vld [vmem:[#allocation8 + $0x30] sm:$0xff]   ;;  %v2263_v45 = vld [vmem:[#allocation8 + $0x78] sm:$0xff]  }
 0x156   :  { %v2262_v44 = vld [vmem:[#allocation8 + $0xb0] sm:$0xff]  }
 0x158   :  { %1235 = vmatpush1.bf16.msra.mxu0 %v2187_v46  ;;  %1321 = vmatpush1.bf16.msra.mxu1 %v2190_v47  ;;  %v2264_v46 = vld [vmem:[#allocation8 + $0xf8] sm:$0xff]  }
 0x159   :  { %1236 = vmatprep.subr.bf16.mxu0 %v2195_v48  ;;  %1322 = vmatprep.subr.bf16.mxu1 %v2198_v49  ;;  %v2265_v47 = vld [vmem:[#allocation8 + $0x38] sm:$0xff]  }
 0x15a   :  { %v2266_v48 = vld [vmem:[#allocation8 + $0xb8] sm:$0xff]  }
 0x15b   :  { %v513_v49 = vld [vmem:[%s2496_s4 + $0x4] sm:$0xf] }
 0x15c   :  { %1237 = vmatpush1.bf16.msra.mxu0 %v2193_v50  ;;  %1323 = vmatpush1.bf16.msra.mxu1 %v2196_v51  ;;  %v518_v50 = vrot.slane %v513_v49, %v103_v38  ;;  %v526_v51 = vrot.slane %v513_v49, %v111_v53 }
 0x15d   :  { %1238 = vmatprep.subr.bf16.mxu0 %v2201_v52  ;;  %1324 = vmatprep.subr.bf16.mxu1 %v2204_v54  ;;  %v522_v52 = vrot.slane %v513_v49, %v107_v40  ;;  %v530_v54 = vrot.slane %v513_v49, %v115_v56 }
 0x160   :  { %1239 = vmatpush1.bf16.msra.mxu0 %v2199_v55  ;;  %1325 = vmatpush1.bf16.msra.mxu1 %v2202_v57 }
 0x161   :  { %1240 = vmatprep.subr.bf16.mxu0 %v2207_v58  ;;  %1326 = vmatprep.subr.bf16.mxu1 %v2210_v59 }
 0x164   :  { %1241 = vmatpush1.bf16.msra.mxu0 %v2205_v60  ;;  %1327 = vmatpush1.bf16.msra.mxu1 %v2208_v61 }
 0x165   :  { %1242 = vmatprep.subr.bf16.mxu0 %v2213_v62  ;;  %1328 = vmatprep.subr.bf16.mxu1 %v2216_v63 }
 0x168   :  { %1243 = vmatpush1.bf16.msra.mxu0 %v2211_v0  ;;  %1329 = vmatpush1.bf16.msra.mxu1 %v2214_v1 }
 0x169   :  { %1244 = vmatprep.subr.bf16.mxu0 %v2219_v2  ;;  %1330 = vmatprep.subr.bf16.mxu1 %v2222_v3 }
 0x16c   :  { %1245 = vmatpush1.bf16.msra.mxu0 %v2217_v4  ;;  %1331 = vmatpush1.bf16.msra.mxu1 %v2220_v5 }
 0x16d   :  { %1246 = vmatprep.subr.bf16.mxu0 %v2225_v6  ;;  %1332 = vmatprep.subr.bf16.mxu1 %v2228_v7 }
 0x170   :  { %1247 = vmatpush1.bf16.msra.mxu0 %v2223_v8  ;;  %1333 = vmatpush1.bf16.msra.mxu1 %v2226_v9 }
 0x171   :  { %1248 = vmatprep.subr.bf16.mxu0 %v2231_v10  ;;  %1334 = vmatprep.subr.bf16.mxu1 %v2234_v11 }
 0x174   :  { %1249 = vmatpush1.bf16.msra.mxu0 %v2229_v12  ;;  %1335 = vmatpush1.bf16.msra.mxu1 %v2232_v13 }
 0x175   :  { %1923 = vmatprep.subr.bf16.mxu0 %v2235_v14  ;;  %1945 = vmatprep.subr.bf16.mxu1 %v2236_v15 }
 0x177   :  { %1251 = vmatmul.mubr.bf16.vlgmr.msra.gmra.mrb[4].mxu0 %v2459_v21  ;;  %1337 = vmatmul.mubr.bf16.vlgmr.msra.gmra.mrb[4].mxu1 %v2459_v21  ;;  %v2250_v21 = vld [vmem:[#allocation8 + $0x98] sm:$0xff]  }
 0x178   :  { %1924 = vmatpush3.bf16.msra.mxu0 %v2237_v16  ;;  %1946 = vmatpush3.bf16.msra.mxu1 %v2238_v17  ;;  %v1890_v17 = vld [vmem:[%s2496_s4 + $0x8] ss:$0 sm:$0xff]  ;;  %s2373_s4 = smov [#allocation9]  }
 0x179   :  { %1925 = vmatprep.subr.bf16.mxu0 %v2239_v18  ;;  %1947 = vmatprep.subr.bf16.mxu1 %v2240_v19  ;;  %s1716_s13 = sshll.u32 %s2373_s4, 4  ;;  %s1717_s13 = int_to_ptr.vmem [resolvable:$true] %s1716_s13 }
 0x17a   :  { %s2337_s14 = scalar_lea.vmem %s1717_s13, 256  ;;  %p2342_p11 = scmp.lt.s32.totalorder %s1717_s13, %s1717_s13 }
 0x17b   :  { %p2338_p10 = scmp.ne.s32.totalorder %s1717_s13, %s2337_s14  ;;  %p2343_p12 = scmp.lt.s32.totalorder %s2337_s14, %s2337_s14 }
 0x17c   :  { %1926 = vmatpush3.bf16.msra.mxu0 %v2241_v20  ;;  %1948 = vmatpush3.bf16.msra.mxu1 %v2242_v22 }
 0x17d   :  { %1927 = vmatprep.subr.bf16.mxu0 %v2243_v23  ;;  %1949 = vmatprep.subr.bf16.mxu1 %v2244_v24  ;;  %p2344_p13 = por %p2343_p12, %p2342_p11 }
 0x17f   :  { %p2345_p0 = pnand %p2344_p13, %p2338_p10 }
 0x180   :  { %1928 = vmatpush3.bf16.msra.mxu0 %v2245_v25  ;;  %1950 = vmatpush3.bf16.msra.mxu1 %v2246_v26 }
 0x181   :  { %1929 = vmatprep.subr.bf16.mxu0 %v2247_v27  ;;  %1951 = vmatprep.subr.bf16.mxu1 %v2248_v28 }
 0x184   :  { %1930 = vmatpush3.bf16.msra.mxu0 %v2249_v29  ;;  %1952 = vmatpush3.bf16.msra.mxu1 %v2250_v21 }
 0x185   :  { %1931 = vmatprep.subr.bf16.mxu0 %v2251_v30  ;;  %1953 = vmatprep.subr.bf16.mxu1 %v2252_v31 }
 0x188   :  { %1932 = vmatpush3.bf16.msra.mxu0 %v2253_v32  ;;  %1954 = vmatpush3.bf16.msra.mxu1 %v2254_v33  ;;  %v1706_v32 = vstv %s2492_s0 }
 0x189   :  { %1933 = vmatprep.subr.bf16.mxu0 %v2255_v34  ;;  %1955 = vmatprep.subr.bf16.mxu1 %v2256_v35 }
 0x18c   :  { %1934 = vmatpush3.bf16.msra.mxu0 %v2257_v36  ;;  %1956 = vmatpush3.bf16.msra.mxu1 %v2258_v39 }
 0x18d   :  { %1935 = vmatprep.subr.bf16.mxu0 %v2259_v41  ;;  %1957 = vmatprep.subr.bf16.mxu1 %v2260_v42 }
 0x190   :  { %1936 = vmatpush3.bf16.msra.mxu0 %v2261_v43  ;;  %1958 = vmatpush3.bf16.msra.mxu1 %v2262_v44 }
 0x191   :  { %1937 = vmatprep.subr.bf16.mxu0 %v2263_v45  ;;  %1959 = vmatprep.subr.bf16.mxu1 %v2264_v46 }
 0x194   :  { %1938 = vmatpush3.bf16.msra.mxu0 %v2265_v47  ;;  %1960 = vmatpush3.bf16.msra.mxu1 %v2266_v48 }
 0x24a   :  { %v1252_v55 = vpop.f32.mrb[4].mxu0  ;;  %v1338_v57 = vpop.f32.mrb[4].mxu1 }
 0x24b   :  { %v1967_v58 = vadd.f32 %v1252_v55, %v518_v50  ;;  %v1971_v59 = vadd.f32 %v1338_v57, %v526_v51  ;;  %v1254_v60 = vpop.f32.mrb[5].mxu0  ;;  %v1340_v61 = vpop.f32.mrb[5].mxu1 }
 0x24c   :  { %v1968_v62 = vadd.f32 %v1254_v60, %v522_v52  ;;  %v1972_v63 = vadd.f32 %v1340_v61, %v530_v54  ;;  %v1256_v0 = vpop.f32.mrb[6].mxu0  ;;  %v1342_v1 = vpop.f32.mrb[6].mxu1 }
 0x24d   :  { %v1969_v38 = vadd.f32 %v1256_v0, %v518_v50  ;;  %v1973_v2 = vadd.f32 %v1342_v1, %v526_v51  ;;  %v1258_v3 = vpop.f32.mrb[7].mxu0  ;;  %v1344_v53 = vpop.f32.mrb[7].mxu1  ;;  %v1347_v40 = vmax.f32 %v1967_v58, 0.0  ;;  %v1349_v6 = vmax.f32 %v1971_v59, 0.0 }
 0x24e   :  { %v1970_v4 = vadd.f32 %v1258_v3, %v522_v52  ;;  %v1974_v5 = vadd.f32 %v1344_v53, %v530_v54  ;;  %v1348_v7 = vmax.f32 %v1968_v62, 0.0  ;;  %v1350_v8 = vmax.f32 %v1972_v63, 0.0 }
 0x24f   :  { %v1351_v37 = vmax.f32 %v1969_v38, 0.0  ;;  %v1353_v56 = vmax.f32 %v1973_v2, 0.0 }
 0x250   :  { %v1352_v9 = vmax.f32 %v1970_v4, 0.0  ;;  %v1354_v10 = vmax.f32 %v1974_v5, 0.0 }
 0x251   :  { %v1355_v11 = vpack.c.bf16 %v1351_v37, %v1347_v40  ;;  %v1357_v12 = vpack.c.bf16 %v1353_v56, %v1349_v6 }
 0x252   :  { %v1356_v13 = vpack.c.bf16 %v1352_v9, %v1348_v7  ;;  %v1358_v14 = vpack.c.bf16 %v1354_v10, %v1350_v8 }
 0x254   :  { %1654 = vmatprep.mubr.bf16.mxu0 %v1356_v13  ;;  %1695 = vmatprep.mubr.bf16.mxu1 %v1358_v14 }
 0x255   :  { %1655 = vmatmul.mubr.bf16.vlgmr.msra.gmra.mrb[8].mxu0 %v1355_v11  ;;  %1696 = vmatmul.mubr.bf16.vlgmr.msra.gmra.mrb[8].mxu1 %v1357_v12 }
 0x328   :  { %v1939_v15 = vpop.f32.mrb[8].mxu0  ;;  %v1961_v16 = vpop.f32.mrb[8].mxu1 }
 0x329   :  { %v1940_v18 = vpop.f32.mrb[9].mxu0  ;;  %v1962_v19 = vpop.f32.mrb[9].mxu1 }
 0x32a   :  { %v1941_v20 = vadd.f32 %v1940_v18, %v1939_v15  ;;  %v1963_v22 = vadd.f32 %v1962_v19, %v1961_v16  ;;  %v1942_v23 = vpop.f32.mrb[10].mxu0  ;;  %v1964_v24 = vpop.f32.mrb[10].mxu1 }
 0x32b   :  { %v1943_v25 = vpop.f32.mrb[11].mxu0  ;;  %v1965_v26 = vpop.f32.mrb[11].mxu1 }
 0x32c   :  { %v1657_v27 = vadd.f32 %v1941_v20, %v1890_v17  ;;  %v1944_v28 = vadd.f32 %v1943_v25, %v1942_v23  ;;  %v1966_v29 = vadd.f32 %v1965_v26, %v1964_v24 }
 0x32e   :  { %v1698_v21 = vadd.f32 %v1963_v22, %v1657_v27  ;;  %v1660_v30 = vadd.f32 %v1944_v28, %v1890_v17 }
 0x330   :  { %2267 = vtanh.f32 %v1698_v21  ;;  %v1701_v31 = vadd.f32 %v1966_v29, %v1660_v30 }
 0x332   :  { %2269 = vtanh.f32 %v1701_v31 }
 0x33a   :  { %v2268_v33 = vpop.eup %2267 }
 0x33b   :  { %v1707_v34 = vmul.f32 %v2268_v33, %v1706_v32 }
 0x33c   :  { %v2270_v35 = vpop.eup %2269 }
 0x33d   :  { %v1708_v36 = vmul.f32 %v2270_v35, %v1706_v32  ;;  %1709 = vst [vmem:[#allocation9] sm:$0xff] %v1707_v34 }
 0x33f   :  { %1710 = vst [vmem:[#allocation9 + $0x8] sm:$0xff] %v1708_v36 }
 0x340   :  { %2348 = shalt.err (!%p2345_p0)
}
 0x341   :  { %s2349_s0 = scalar_lea.hbm %s2497_s5, 256 }
 0x342   :  { %p2350_p1 = scmp.ne.s32.totalorder %s2497_s5, %s2349_s0  ;;  %p2353_p2 = scmp.lt.u32.totalorder %s2349_s0, %s2497_s5 }
 0x344   :  { %p2355_p3 = pnand %p2353_p2, %p2350_p1 }
 0x346   :  { %2358 = shalt.err (!%p2355_p3)
}
 0x347   :  { %s2374_s20 = smov 128   ;;  %s2375_s21 = smov 8  }
 0x348   :  { %1722 = dma.vmem_to_hbm [thread:$0]  %s1717_s13, 256, %s2497_s5, [#allocation5], %s2374_s20, %s2374_s20, %s2375_s21  }
 0x349   :  { %2363 = dma.done.wait [#allocation5], 256  }
 0x34a   :  { %2364 = vsyncadd [#allocation5], 4294967040 }
 0x34b   :  { %1726 = vsyncpa [#allocation4], 1 }
 0x34c   :  { %1727 = vsyncpa [#allocation7], 1 }
 0x34d   :  { %1728 = vsyncpa [#allocation5], 1 }

</bundles_post_ra>
